<compile_context>
chip_gen: v6e
topology: v6e:2x2x1
jax: 0.10.0
libtpu: 0.0.40
codegen_flags: <defaults>
</compile_context>

<pallas_src>
import functools

import jax
import jax.numpy as jnp
import numpy as np
from jax import lax
from jax.experimental import pallas as pl
from jax.experimental.pallas import tpu as pltpu


def _physical_vmem_bytes():
    """Per-core physical VMEM; conservative fallback (v7x = 64 MiB) if query fails."""
    try:
        return int(pltpu.get_tpu_info().vmem_capacity_bytes)
    except Exception:
        return 64 << 20


def _row_tile(rows, row_bytes, tile_bytes, max_rows):
    """Pick a row-tile: as large as the byte budget allows, multiple of 8 (or == rows)."""
    if rows <= 8:
        return rows
    tn = tile_bytes // max(row_bytes, 1)
    if max_rows is not None:
        tn = min(tn, max_rows)
    tn = min(tn, rows)
    if tn >= rows:
        return rows
    return max(8, (tn // 8) * 8)


# --------------------- Pass 1: per-tile column sums (parallel grid) ---------------------
def _colsum_kernel(t_ref, p_ref, *, rows_total, tile_rows, masked):
    t = t_ref[...].astype(jnp.float32)
    if masked:  # static flag: only the ragged-edge case pays for the mask
        row0 = pl.program_id(0) * tile_rows
        rid = row0 + lax.broadcasted_iota(jnp.int32, t_ref.shape, 0)
        t = jnp.where(rid < rows_total, t, 0.0)
    p_ref[0] = jnp.sum(t, axis=0, keepdims=True)


# --------------------- Pass 2: elementwise weight select (parallel grid) ----------------
def _weights_kernel(invz_ref, invc_ref, t_ref, w_ref):
    t = t_ref[...]
    w = jnp.where(t == 0,
                  jnp.broadcast_to(invz_ref[...], t.shape),
                  jnp.broadcast_to(invc_ref[...], t.shape))
    w_ref[...] = w.astype(w_ref.dtype)


# --------------------- Fused small-problem path (single launch) -------------------------
def _fused_kernel(avg_ref, counts_ref, zcounts_ref, t_ref,
                  w_ref, newc_ref, newz_ref, *, n_rows):
    t = t_ref[...]
    tt = jnp.sum(t.astype(jnp.float32), axis=0, keepdims=True)      # (1, C)
    new_c = counts_ref[...] + tt
    new_z = zcounts_ref[...] + (jnp.float32(n_rows) - tt)
    avg = avg_ref[0]
    invc = avg / new_c
    invz = avg / new_z
    newc_ref[...] = new_c
    newz_ref[...] = new_z
    w_ref[...] = jnp.where(t == 0,
                           jnp.broadcast_to(invz, t.shape),
                           jnp.broadcast_to(invc, t.shape)).astype(w_ref.dtype)


def balance_labels_forward(inputs, target, counts, zerocounts, total, *,
                           weights_dtype=jnp.float32,
                           force_tiled=False,
                           max_row_tile=None):
    """Functional BalanceLabels forward.

    Returns (out, weights, new_counts, new_zerocounts, new_total). `out` is the module's
    forward value (value-identical to `inputs`); `weights` is what ScaleGrad would use in
    backward. All state stays on device.
    """
    N, C = target.shape
    counts_row = jnp.asarray(counts, jnp.float32).reshape(1, C)
    zcounts_row = jnp.asarray(zerocounts, jnp.float32).reshape(1, C)
    total_f = jnp.asarray(total, jnp.float32)
    new_total = total_f + jnp.float32(N)
    avg = new_total * jnp.float32(0.5)

    in_isz = jnp.dtype(target.dtype).itemsize
    out_isz = jnp.dtype(weights_dtype).itemsize
    phys_vmem = _physical_vmem_bytes()

    # ---------------- Fused fast path: whole problem resident in VMEM ----------------
    fused_need = N * C * (in_isz + out_isz + 4) + 16 * C           # + f32 temporaries
    fused_budget = min(phys_vmem // 4, 16 << 20)
    if (not force_tiled) and fused_need <= fused_budget:
        vlim = int(max(2 * fused_need + (2 << 20), 16 << 20))
        w, newc, newz = pl.pallas_call(
            functools.partial(_fused_kernel, n_rows=N),
            grid=(1,),
            out_shape=(
                jax.ShapeDtypeStruct((N, C), weights_dtype),
                jax.ShapeDtypeStruct((1, C), jnp.float32),
                jax.ShapeDtypeStruct((1, C), jnp.float32),
            ),
            in_specs=[
                pl.BlockSpec(memory_space=pltpu.MemorySpace.SMEM),   # avg scalar
                pl.BlockSpec((1, C), lambda i: (0, 0)),              # counts
                pl.BlockSpec((1, C), lambda i: (0, 0)),              # zerocounts
                pl.BlockSpec((N, C), lambda i: (0, 0)),              # target (full block)
            ],
            out_specs=(
                pl.BlockSpec((N, C), lambda i: (0, 0)),
                pl.BlockSpec((1, C), lambda i: (0, 0)),
                pl.BlockSpec((1, C), lambda i: (0, 0)),
            ),
            compiler_params=pltpu.CompilerParams(
                dimension_semantics=("arbitrary",),
                vmem_limit_bytes=vlim),
            cost_estimate=pl.CostEstimate(
                flops=4 * N * C, transcendentals=0,
                bytes_accessed=N * C * (in_isz + out_isz) + 16 * C),
        )(avg.reshape(1), counts_row, zcounts_row, target)
        # ScaleGrad.forward returns inputs.clone(); value-identical -> alias, no HBM copy.
        return inputs, w, newc[0], newz[0], new_total

    # ---------------- Tiled streaming path ----------------
    # Lane-dense re-view for small class counts: (N, C) -> (N*C/128, 128) when C | 128.
    use_flat = (C < 128) and (128 % C == 0) and ((N * C) % 128 == 0)
    if use_flat:
        L, R = 128, (N * C) // 128
        t_view = target.reshape(R, L)          # row-major contiguous: free re-view
    else:
        L, R = C, N
        t_view = target

    # Per-generation tile budget (double-buffered in + out must fit the scoped limit).
    tile_bytes = (4 << 20) if phys_vmem <= (64 << 20) else (8 << 20)
    TN = _row_tile(R, L * in_isz, tile_bytes, max_row_tile)
    n_tiles = pl.cdiv(R, TN)
    masked = (R % TN) != 0
    tile_in_bytes = TN * L * in_isz
    tile_out_bytes = TN * L * out_isz
    vmem_cap = max(phys_vmem - (2 << 20), 16 << 20)

    # Pass 1: per-tile column sums, fully "parallel" (megacore-shardable on v7x).
    vlim1 = int(min(max(2 * tile_in_bytes + (4 << 20), 16 << 20), vmem_cap))
    partials = pl.pallas_call(
        functools.partial(_colsum_kernel, rows_total=R, tile_rows=TN, masked=masked),
        grid=(n_tiles,),
        out_shape=jax.ShapeDtypeStruct((n_tiles, 1, L), jnp.float32),
        in_specs=[pl.BlockSpec((TN, L), lambda i: (i, 0))],
        out_specs=pl.BlockSpec((1, 1, L), lambda i: (i, 0, 0)),
        compiler_params=pltpu.CompilerParams(
            dimension_semantics=("parallel",),
            vmem_limit_bytes=vlim1),
        cost_estimate=pl.CostEstimate(
            flops=R * L, transcendentals=0,
            bytes_accessed=R * L * in_isz + n_tiles * L * 4),
    )(t_view)

    # Tiny O(C) combine + state update in the wrapper (fuses into one small op under jit).
    colsum = jnp.sum(partials, axis=(0, 1))                         # (L,)
    tt = colsum.reshape(-1, C).sum(axis=0) if use_flat else colsum  # fold lanes -> classes
    new_c = counts_row[0] + tt
    new_z = zcounts_row[0] + (jnp.float32(N) - tt)
    invc = avg / new_c
    invz = avg / new_z
    reps = L // C
    invc_row = jnp.tile(invc, reps).reshape(1, L)
    invz_row = jnp.tile(invz, reps).reshape(1, L)

    # Pass 2: lane-dense elementwise weight select, "parallel" grid.
    vlim2 = int(min(max(2 * (tile_in_bytes + tile_out_bytes) + (4 << 20), 16 << 20),
                    vmem_cap))
    weights_view = pl.pallas_call(
        _weights_kernel,
        grid=(n_tiles,),
        out_shape=jax.ShapeDtypeStruct((R, L), weights_dtype),
        in_specs=[
            pl.BlockSpec((1, L), lambda i: (0, 0)),      # avg / new_zerocounts
            pl.BlockSpec((1, L), lambda i: (0, 0)),      # avg / new_counts
            pl.BlockSpec((TN, L), lambda i: (i, 0)),     # target tile
        ],
        out_specs=pl.BlockSpec((TN, L), lambda i: (i, 0)),
        compiler_params=pltpu.CompilerParams(
            dimension_semantics=("parallel",),
            vmem_limit_bytes=vlim2),
        cost_estimate=pl.CostEstimate(
            flops=R * L, transcendentals=0,
            bytes_accessed=R * L * (in_isz + out_isz) + 2 * L * 4),
    )(invz_row, invc_row, t_view)

    weights = weights_view.reshape(N, C)
    # ScaleGrad.forward returns inputs.clone(); value-identical -> alias, no HBM copy.
    return inputs, weights, new_c, new_z, new_total


# --------------------------------- reference & tests ---------------------------------
def _reference(inputs, target, counts, zerocounts, total):
    inputs = np.asarray(inputs, np.float32)
    target = np.asarray(target, np.float32)
    n = target.shape[0]
    tt = target.sum(0)
    new_c = np.asarray(counts, np.float32) + tt
    new_z = np.asarray(zerocounts, np.float32) + (n - tt)
    new_total = float(total) + n
    w = np.where(target == 0.0, new_z[None, :], new_c[None, :])
    weights = (new_total / 2.0) / w
    return inputs.copy(), weights, new_c, new_z, new_total


def _check(res, ref):
    out, w, c, z, tot = res
    r_out, r_w, r_c, r_z, r_tot = ref
    np.testing.assert_allclose(np.asarray(out, np.float32), r_out, rtol=1e-6, atol=1e-6)
    np.testing.assert_allclose(np.asarray(w, np.float32), r_w, rtol=1e-5, atol=1e-6)
    np.testing.assert_allclose(np.asarray(c), r_c, rtol=1e-6, atol=1e-6)
    np.testing.assert_allclose(np.asarray(z), r_z, rtol=1e-6, atol=1e-6)
    np.testing.assert_allclose(float(tot), r_tot, rtol=1e-6, atol=1e-6)


if __name__ == "__main__":
    key = jax.random.PRNGKey(0)
    k1, k2, k3, k4 = jax.random.split(key, 4)

    # Case 1 (module-typical small shapes): fused VMEM-resident path.
    N, C = 8, 16
    inputs = jax.random.normal(k1, (N, C), dtype=jnp.float32)
    target = (jax.random.uniform(k2, (N, C)) > 0.5).astype(jnp.float32)
    counts = jnp.zeros((C,), jnp.float32)
    zerocounts = jnp.zeros((C,), jnp.float32)
    res1 = balance_labels_forward(inputs, target, counts, zerocounts, 0.0)
    jax.block_until_ready(res1)
    _check(res1, _reference(inputs, target, counts, zerocounts, 0.0))

    # Case 2: force the tiled streaming path (lane-dense flattened (N*C/128, 128) view).
    res2 = balance_labels_forward(inputs, target, counts, zerocounts, 0.0,
                                  force_tiled=True)
    jax.block_until_ready(res2)
    _check(res2, _reference(inputs, target, counts, zerocounts, 0.0))

    # Case 3: tiled path, no flattening (C doesn't divide 128), ragged last row tile
    # (exercises the in-kernel row mask / OOB-store masking), non-zero prior state.
    N3, C3 = 20, 48
    inputs3 = jax.random.normal(k3, (N3, C3), dtype=jnp.float32)
    target3 = (jax.random.uniform(k4, (N3, C3)) > 0.3).astype(jnp.float32)
    counts3 = jnp.arange(C3, dtype=jnp.float32) + 1.0
    zcounts3 = jnp.arange(C3, dtype=jnp.float32) * 2.0 + 3.0
    res3 = balance_labels_forward(inputs3, target3, counts3, zcounts3, 37.0,
                                  force_tiled=True, max_row_tile=8)
    jax.block_until_ready(res3)
    _check(res3, _reference(inputs3, target3, counts3, zcounts3, 37.0))

    print("KERNEL_OK")
</pallas_src>

<mosaic_0001>
module attributes {stable_mosaic.version = 11 : i64} {
  func.func @_fused_kernel(%arg0: i32, %arg1: memref<1xf32, #tpu.memory_space<smem>>, %arg2: memref<1x16xf32, #tpu.memory_space<vmem>>, %arg3: memref<1x16xf32, #tpu.memory_space<vmem>>, %arg4: memref<8x16xf32, #tpu.memory_space<vmem>>, %arg5: memref<8x16xf32, #tpu.memory_space<vmem>>, %arg6: memref<1x16xf32, #tpu.memory_space<vmem>>, %arg7: memref<1x16xf32, #tpu.memory_space<vmem>>) attributes {dimension_semantics = [#tpu.dimension_semantics<arbitrary>], iteration_bounds = array<i64: 1>, scalar_prefetch = 0 : i64, scratch_operands = 0 : i64, tpu.core_type = #tpu.core_type<tc>, window_params = [{transform_indices = @transform_0, window_bounds = array<i64: 1>}, {pipeline_mode = #tpu.pipeline_mode<synchronous>, transform_indices = @transform_1, window_bounds = array<i64: 1, 16>}, {pipeline_mode = #tpu.pipeline_mode<synchronous>, transform_indices = @transform_2, window_bounds = array<i64: 1, 16>}, {pipeline_mode = #tpu.pipeline_mode<synchronous>, transform_indices = @transform_3, window_bounds = array<i64: 8, 16>}, {pipeline_mode = #tpu.pipeline_mode<synchronous>, transform_indices = @transform_4, window_bounds = array<i64: 8, 16>}, {pipeline_mode = #tpu.pipeline_mode<synchronous>, transform_indices = @transform_5, window_bounds = array<i64: 1, 16>}, {pipeline_mode = #tpu.pipeline_mode<synchronous>, transform_indices = @transform_6, window_bounds = array<i64: 1, 16>}]} {
    %c0 = arith.constant 0 : index
    %c0_0 = arith.constant 0 : index
    %0 = vector.load %arg4[%c0, %c0_0] : memref<8x16xf32, #tpu.memory_space<vmem>>, vector<8x16xf32>
    %cst = arith.constant dense<0.000000e+00> : vector<16xf32>
    %1 = vector.multi_reduction <add>, %0, %cst [0] : vector<8x16xf32> to vector<16xf32>
    %2 = vector.shape_cast %1 : vector<16xf32> to vector<1x16xf32>
    %c0_1 = arith.constant 0 : index
    %c0_2 = arith.constant 0 : index
    %3 = vector.load %arg2[%c0_1, %c0_2] : memref<1x16xf32, #tpu.memory_space<vmem>>, vector<1x16xf32>
    %4 = arith.addf %3, %2 : vector<1x16xf32>
    %c0_3 = arith.constant 0 : index
    %c0_4 = arith.constant 0 : index
    %5 = vector.load %arg3[%c0_3, %c0_4] : memref<1x16xf32, #tpu.memory_space<vmem>>, vector<1x16xf32>
    %cst_5 = arith.constant 8.000000e+00 : f32
    %6 = vector.broadcast %cst_5 : f32 to vector<1x16xf32>
    %7 = arith.subf %6, %2 : vector<1x16xf32>
    %8 = arith.addf %5, %7 : vector<1x16xf32>
    %c0_6 = arith.constant 0 : index
    %9 = memref.load %arg1[%c0_6] : memref<1xf32, #tpu.memory_space<smem>>
    %10 = vector.broadcast %9 : f32 to vector<1x16xf32>
    %11 = arith.divf %10, %4 : vector<1x16xf32>
    %12 = vector.broadcast %9 : f32 to vector<1x16xf32>
    %13 = arith.divf %12, %8 : vector<1x16xf32>
    %c0_7 = arith.constant 0 : index
    %c0_8 = arith.constant 0 : index
    %14 = vector.load %arg6[%c0_7, %c0_8] : memref<1x16xf32, #tpu.memory_space<vmem>>, vector<1x16xf32>
    tpu.vector_store %arg6[%c0_7, %c0_8], %4 {strides = array<i32>} : memref<1x16xf32, #tpu.memory_space<vmem>>, vector<1x16xf32>,
    %c0_9 = arith.constant 0 : index
    %c0_10 = arith.constant 0 : index
    %15 = vector.load %arg7[%c0_9, %c0_10] : memref<1x16xf32, #tpu.memory_space<vmem>>, vector<1x16xf32>
    tpu.vector_store %arg7[%c0_9, %c0_10], %8 {strides = array<i32>} : memref<1x16xf32, #tpu.memory_space<vmem>>, vector<1x16xf32>,
    %cst_11 = arith.constant 0.000000e+00 : f32
    %16 = vector.broadcast %cst_11 : f32 to vector<8x16xf32>
    %17 = arith.cmpf oeq, %0, %16 : vector<8x16xf32>
    %18 = vector.shape_cast %13 : vector<1x16xf32> to vector<1x16xf32>
    %19 = vector.broadcast %18 : vector<1x16xf32> to vector<8x16xf32>
    %20 = vector.shape_cast %11 : vector<1x16xf32> to vector<1x16xf32>
    %21 = vector.broadcast %20 : vector<1x16xf32> to vector<8x16xf32>
    %22 = arith.select %17, %19, %21 : vector<8x16xi1>, vector<8x16xf32>
    %c0_12 = arith.constant 0 : index
    %c0_13 = arith.constant 0 : index
    %23 = vector.load %arg5[%c0_12, %c0_13] : memref<8x16xf32, #tpu.memory_space<vmem>>, vector<8x16xf32>
    tpu.vector_store %arg5[%c0_12, %c0_13], %22 {strides = array<i32>} : memref<8x16xf32, #tpu.memory_space<vmem>>, vector<8x16xf32>,
    return
  }
  func.func @transform_0(%arg0: i32) -> i32 {
    %c0_i32 = arith.constant 0 : i32
    %c0_i32_0 = arith.constant 0 : i32
    return %c0_i32 : i32
  }
  func.func @transform_1(%arg0: i32) -> (i32, i32) {
    %c0_i32 = arith.constant 0 : i32
    %c0_i32_0 = arith.constant 0 : i32
    %c0_i32_1 = arith.constant 0 : i32
    return %c0_i32, %c0_i32_0 : i32, i32
  }
  func.func @transform_2(%arg0: i32) -> (i32, i32) {
    %c0_i32 = arith.constant 0 : i32
    %c0_i32_0 = arith.constant 0 : i32
    %c0_i32_1 = arith.constant 0 : i32
    return %c0_i32, %c0_i32_0 : i32, i32
  }
  func.func @transform_3(%arg0: i32) -> (i32, i32) {
    %c0_i32 = arith.constant 0 : i32
    %c0_i32_0 = arith.constant 0 : i32
    %c0_i32_1 = arith.constant 0 : i32
    return %c0_i32, %c0_i32_0 : i32, i32
  }
  func.func @transform_4(%arg0: i32) -> (i32, i32) {
    %c0_i32 = arith.constant 0 : i32
    %c0_i32_0 = arith.constant 0 : i32
    %c0_i32_1 = arith.constant 0 : i32
    return %c0_i32, %c0_i32_0 : i32, i32
  }
  func.func @transform_5(%arg0: i32) -> (i32, i32) {
    %c0_i32 = arith.constant 0 : i32
    %c0_i32_0 = arith.constant 0 : i32
    %c0_i32_1 = arith.constant 0 : i32
    return %c0_i32, %c0_i32_0 : i32, i32
  }
  func.func @transform_6(%arg0: i32) -> (i32, i32) {
    %c0_i32 = arith.constant 0 : i32
    %c0_i32_0 = arith.constant 0 : i32
    %c0_i32_1 = arith.constant 0 : i32
    return %c0_i32, %c0_i32_0 : i32, i32
  }
}

</mosaic_0001>

<bundles_post_ra>
// kernel: tpu_custom_call.1
= control target key start
LH: loop header
LB: loop body
LE: loop exit
PB: predicated region body
PF: predicated region fallthrough
CT: control target
= control target key end

     0   :  { %13 = vsyncpa [#allocation4], 0  ;;  %s273_s0 = inlined_call_operand.<no memory space> [shape: f32[1], index: 0, kind: input, shape index: {}]   ;;  %s274_s1 = inlined_call_operand.vmem [shape: f32[1,16], index: 1, kind: input, shape index: {}]   ;;  %s275_s2 = inlined_call_operand.vmem [shape: f32[1,16], index: 2, kind: input, shape index: {}]   ;;  %s276_s3 = inlined_call_operand.hbm [shape: f32[8,16], index: 3, kind: input, shape index: {}]   ;;  %s277_s4 = inlined_call_operand.hbm [shape: f32[8,16], index: 4, kind: output, shape index: {0}]   ;;  %s278_s5 = inlined_call_operand.hbm [shape: f32[1,16], index: 5, kind: output, shape index: {1}]   ;;  %s279_s6 = inlined_call_operand.hbm [shape: f32[1,16], index: 6, kind: output, shape index: {2}]  }
   0x1   :  { %14 = vsyncpa [#allocation5], 0 }
   0x2   :  { %15 = vsyncpa [#allocation8], 0  ;;  %s209_s21 = smov [#allocation3]  }
   0x3   :  { %s28_s22 = sshll.u32 %s209_s21, 4  ;;  %s29_s22 = int_to_ptr.vmem [resolvable:$true] %s28_s22 }
   0x4   :  { %s131_s23 = scalar_lea.vmem %s29_s22, 128  ;;  %p136_p1 = scmp.lt.s32.totalorder %s29_s22, %s29_s22 }
   0x5   :  { %p132_p0 = scmp.ne.s32.totalorder %s29_s22, %s131_s23  ;;  %p137_p2 = scmp.lt.s32.totalorder %s131_s23, %s131_s23 }
   0x7   :  { %p138_p3 = por %p137_p2, %p136_p1 }
   0x9   :  { %p139_p4 = pnand %p138_p3, %p132_p0 }
   0xb   :  { %142 = shalt.err (!%p139_p4)
}
   0xc   :  { %31 = dma.hbm_to_vmem [thread:$0]  %s276_s3, 128, %s29_s22, [#allocation4]  }
   0xd   :  { %203 = dma.done.wait [#allocation4], 128  }
   0xe   :  { %204 = vsyncadd [#allocation4], 4294967168  ;;  %vm36_vm0 = vcmask 130048   ;;  %v35_v0 = vld [vmem:[#allocation3] sm:$0xff]  ;;  %s210_s28 = smov [#allocation7]   ;;  %vm55_vm1 = vcmask 122880  }
   0xf   :  { %v37_v1 = vsel %vm36_vm0, %v35_v0, 0.0  ;;  %v44_v7 = vld [vmem:[%s274_s1] sm:$0x1]  ;;  %s89_s29 = sshll.u32 %s210_s28, 4  ;;  %s211_s7 = smov [#allocation9]   ;;  %s90_s29 = int_to_ptr.vmem [resolvable:$true] %s89_s29 }
  0x10   :  { %v38_v2 = vrot.slane %v37_v1, 4  ;;  %v46_v9 = vld [vmem:[%s275_s2] sm:$0x1]  ;;  %s99_s8 = sshll.u32 %s211_s7, 4  ;;  %s143_s9 = scalar_lea.vmem %s90_s29, 16  ;;  %s100_s8 = int_to_ptr.vmem [resolvable:$true] %s99_s8 }
  0x11   :  { %p144_p5 = scmp.ne.s32.totalorder %s90_s29, %s143_s9  ;;  %s147_s1 = scalar_lea.vmem %s90_s29, 32 }
  0x12   :  { %v39_v3 = vadd.f32 %v38_v2, %v37_v1  ;;  %p148_p6 = scmp.lt.s32.totalorder %s90_s29, %s90_s29  ;;  %p149_p7 = scmp.lt.s32.totalorder %s147_s1, %s143_s9 }
  0x14   :  { %v40_v4 = vrot.slane %v39_v3, 2  ;;  %p150_p8 = por %p149_p7, %p148_p6 }
  0x16   :  { %v41_v5 = vadd.f32 %v40_v4, %v39_v3  ;;  %p151_p9 = pnand %p150_p8, %p144_p5 }
  0x18   :  { %v42_v6 = vrot.slane %v41_v5, 1 }
  0x1a   :  { %v43_v8 = vadd.f32 %v42_v6, %v41_v5 }
  0x1c   :  { %v45_v10 = vadd.f32 %v44_v7, %v43_v8  ;;  %v47_v11 = vsub.f32 8.0, %v43_v8 }
  0x1e   :  { %119 = vrcp.f32 %v45_v10  ;;  %56 = vst.msk [vmem:[#allocation7] sm:$0x1] %vm55_vm1, %v45_v10  ;;  %v48_v12 = vadd.f32 %v47_v11, %v46_v9 }
  0x1f   :  { %154 = shalt.err (!%p151_p9)
}
  0x20   :  { %92 = dma.vmem_to_hbm [thread:$0]  %s90_s29, 16, %s278_s5, [#allocation8]   ;;  %121 = vrcp.f32 %v48_v12  ;;  %57 = vst.msk [vmem:[#allocation9] sm:$0x1] %vm55_vm1, %v48_v12 }
  0x21   :  { %s163_s11 = scalar_lea.vmem %s100_s8, 16  ;;  %s167_s12 = scalar_lea.vmem %s100_s8, 32 }
  0x22   :  { %p164_p10 = scmp.ne.s32.totalorder %s100_s8, %s163_s11  ;;  %p168_p11 = scmp.lt.s32.totalorder %s100_s8, %s100_s8 }
  0x23   :  { %p169_p12 = scmp.lt.s32.totalorder %s167_s12, %s163_s11 }
  0x25   :  { %p170_p13 = por %p169_p12, %p168_p11 }
  0x27   :  { %p171_p0 = pnand %p170_p13, %p164_p10 }
  0x29   :  { %174 = shalt.err (!%p171_p0)
}
  0x2a   :  { %102 = dma.vmem_to_hbm [thread:$0]  %s100_s8, 16, %s279_s6, [#allocation8]   ;;  %v60_v13 = vlaneseq  ;;  %v50_v15 = vstv %s273_s0  ;;  %vm58_vm2 = vcmp.eq.f32.partialorder %v35_v0, 0.0 }
  0x2b   :  { %v120_v17 = vpop.eup %119  ;;  %s212_s5 = smov [#allocation6]  }
  0x2c   :  { %v61_v14 = vshrl.u32 %v60_v13, 7  ;;  %v52_v18 = vmul.f32 %v120_v17, %v50_v15  ;;  %s79_s17 = sshll.u32 %s212_s5, 4  ;;  %s80_s17 = int_to_ptr.vmem [resolvable:$true] %s79_s17 }
  0x2d   :  { %v122_v19 = vpop.eup %121  ;;  %s183_s6 = scalar_lea.vmem %s80_s17, 128  ;;  %p188_p2 = scmp.lt.s32.totalorder %s80_s17, %s80_s17 }
  0x2e   :  { %v62_v16 = vsub.s32 0, %v61_v14  ;;  %v54_v20 = vmul.f32 %v122_v19, %v50_v15  ;;  %p184_p1 = scmp.ne.s32.totalorder %s80_s17, %s183_s6  ;;  %p189_p3 = scmp.lt.s32.totalorder %s183_s6, %s183_s6 }
  0x30   :  { %v69_v21 = vrot.slane %v52_v18, %v62_v16  ;;  %v63_v22 = vrot.slane %v54_v20, %v62_v16  ;;  %p190_p4 = por %p189_p3, %p188_p2 }
  0x32   :  { %v71_v23 = vsel %vm58_vm2, %v63_v22, %v69_v21  ;;  %p191_p5 = pnand %p190_p4, %p184_p1 }
  0x33   :  { %72 = vst.msk [vmem:[#allocation6] sm:$0xff] %vm36_vm0, %v71_v23 }
  0x34   :  { %194 = shalt.err (!%p191_p5)
}
  0x35   :  { %82 = dma.vmem_to_hbm [thread:$0]  %s80_s17, 128, %s277_s4, [#allocation5]  }
  0x36   :  { %205 = dma.done.wait [#allocation5], 128  }
  0x37   :  { %206 = vsyncadd [#allocation5], 4294967168 }
  0x38   :  { %207 = dma.done.wait [#allocation8], 32  }
  0x39   :  { %208 = vsyncadd [#allocation8], 4294967264 }
  0x3a   :  { %112 = vsyncpa [#allocation4], 1 }
  0x3b   :  { %113 = vsyncpa [#allocation5], 1 }
  0x3c   :  { %114 = vsyncpa [#allocation8], 1 }

</bundles_post_ra>
